<compile_context>
chip_gen: v7x
topology: tpu7x:2x2x1
jax: 0.10.0
libtpu: 0.0.40
codegen_flags: <defaults>
</compile_context>

<pallas_src>
from math import sqrt

import jax
import jax.numpy as jnp
from jax import lax
from jax.experimental import pallas as pl
from jax.experimental.pallas import tpu as pltpu


# ----------------------------------------------------------------------------
# Parameter / bound setup (glue, mirrors ReinitializationLinearLayer.__init__)
# ----------------------------------------------------------------------------

def calculate_gain_relu() -> float:
    # torch.nn.init.calculate_gain("relu") == sqrt(2)
    return sqrt(2.0)


def get_layer_bound(in_features: int, out_features: int, init: str, gain: float) -> float:
    if init == "xavier":
        return gain * sqrt(6.0 / (in_features + out_features))
    return gain * sqrt(3.0 / in_features)


def get_layer_std(in_features: int, out_features: int, init: str, gain: float) -> float:
    if init == "xavier":
        return gain * sqrt(2.0 / (in_features + out_features))
    return gain * sqrt(1.0 / in_features)


def init_linear_params(key, in_features: int, out_features: int, dtype=jnp.float32):
    """Deterministic stand-in for nn.Linear default init (uniform(-k, k), k=1/sqrt(fan_in))."""
    kw, kb = jax.random.split(key)
    k = 1.0 / sqrt(in_features)
    weight = jax.random.uniform(kw, (out_features, in_features), dtype, minval=-k, maxval=k)
    bias = jax.random.uniform(kb, (out_features,), dtype, minval=-k, maxval=k)
    return weight, bias


# ----------------------------------------------------------------------------
# Forward pass (identity — no kernel)
# ----------------------------------------------------------------------------

def reinit_linear_forward(x: jax.Array) -> jax.Array:
    """ReinitializationLinearLayer.forward: identity pass-through (exact PyTorch semantics)."""
    return x


# ----------------------------------------------------------------------------
# compute_instantaneous_utility(util_type="contribution") as a Pallas kernel
# ----------------------------------------------------------------------------

_SMALL_PATH_BYTES = 2 * 1024 * 1024   # below this, single full-array block
_DEFAULT_ROW_CAP = 1024               # cap on W-row / feature-row tiles
_DEFAULT_LANE_CAP = 2048              # cap on hidden-lane tiles (multiple of 128)


def _vmem_limit_bytes() -> int:
    """Per-generation scoped-VMEM limit with headroom below physical capacity."""
    try:
        phys = int(getattr(pltpu.get_tpu_info(), "vmem_capacity_bytes",
                           64 * 1024 * 1024))
    except Exception:
        phys = 64 * 1024 * 1024        # conservative fallback: v7x per-TC VMEM
    # v7x (64 MiB phys) -> 48 MiB limit; v5e/v6e (128 MiB phys) -> 96 MiB limit.
    return int(min(phys - 16 * 1024 * 1024, 96 * 1024 * 1024))


def _accum_rows(tile_abs, acc_ref, tile_rows: int, tile_h: int):
    """Accumulate column sums of tile_abs (tile_rows, tile_h) into an (8, tile_h)
    f32 scratch using only whole-vreg adds (VPU); the single cross-sublane
    reduction is deferred to the finalize step."""
    g = tile_rows // 8
    rem = tile_rows - g * 8
    if g > 0:
        grouped = tile_abs[: g * 8, :].reshape(g, 8, tile_h)
        acc_ref[...] += jnp.sum(grouped, axis=0)          # vreg-wise vadds
    if rem > 0:
        acc_ref[0:1, :] += jnp.sum(tile_abs[g * 8:, :], axis=0, keepdims=True)


def contribution_utility(out_weight: jax.Array, features: jax.Array, *,
                         row_cap: int = _DEFAULT_ROW_CAP,
                         lane_cap: int = _DEFAULT_LANE_CAP,
                         force_tiled: bool = False) -> jax.Array:
    """util[j] = mean_i |out_weight[i, j]| * mean_b |features[b, j]|  -> (hidden,) f32.

    out_weight: (out_features, hidden); features: (batch, hidden).
    Inputs may be f32 or bf16; the cast to f32 happens inside the kernel.
    """
    out_features, hidden = out_weight.shape
    batch, hidden_f = features.shape
    assert hidden == hidden_f

    inv_scale = 1.0 / float(out_features * batch)   # means folded into sums
    in_bytes = (out_weight.size * out_weight.dtype.itemsize
                + features.size * features.dtype.itemsize)

    # ---------------- small-shape fast path: one full-array block ----------
    if in_bytes <= _SMALL_PATH_BYTES and not force_tiled:
        def small_kernel(w_ref, f_ref, u_ref):
            w_sum = jnp.sum(jnp.abs(w_ref[...].astype(jnp.float32)), axis=0, keepdims=True)
            f_sum = jnp.sum(jnp.abs(f_ref[...].astype(jnp.float32)), axis=0, keepdims=True)
            u_ref[...] = (w_sum * f_sum) * inv_scale

        util = pl.pallas_call(
            small_kernel,
            out_shape=jax.ShapeDtypeStruct((1, hidden), jnp.float32),
            grid_spec=pltpu.PrefetchScalarGridSpec(
                num_scalar_prefetch=0,
                grid=(1,),
                in_specs=[pl.BlockSpec((out_features, hidden), lambda i: (0, 0)),
                          pl.BlockSpec((batch, hidden), lambda i: (0, 0))],
                out_specs=pl.BlockSpec((1, hidden), lambda i: (0, 0)),
            ),
        )(out_weight, features)
        return util[0]

    # ---------------- tiled streaming path ---------------------------------
    # Pad hidden lanes to a multiple of 128 (zeros add nothing to |.| sums) —
    # replaces the old full-hidden fallback that could exceed v7x's 64 MiB VMEM.
    hidden_p = ((hidden + 127) // 128) * 128
    if hidden_p != hidden:
        out_weight = jnp.pad(out_weight, ((0, 0), (0, hidden_p - hidden)))
        features = jnp.pad(features, ((0, 0), (0, hidden_p - hidden)))

    tile_w = out_features if out_features <= row_cap else row_cap
    tile_f = batch if batch <= row_cap else row_cap

    # Hidden tile: the largest lane-dense (multiple-of-128) tile such that the
    # double-buffered input blocks fit the per-chip VMEM budget.  On v5e/v6e
    # this typically yields a single full-hidden tile (best DMA contiguity,
    # single-TC so splitting the parallel axis buys nothing).
    # TODO(synk): on v7x a trace-verified 2-way hidden split (CORE_PARALLEL)
    # could halve the per-TC HBM stream; kept single-heuristic here.
    vmem_limit = _vmem_limit_bytes()
    block_budget = vmem_limit - 8 * 1024 * 1024
    per_lane = 2 * (tile_w * out_weight.dtype.itemsize
                    + tile_f * features.dtype.itemsize)   # double-buffered bytes/lane
    tile_h = min(hidden_p, lane_cap,
                 max(128, (block_budget // per_lane) // 128 * 128))

    n_h = pl.cdiv(hidden_p, tile_h)
    n_w = pl.cdiv(out_features, tile_w)
    n_f = pl.cdiv(batch, tile_f)
    n_red = max(n_w, n_f)
    ragged_w = (out_features % tile_w) != 0
    ragged_f = (batch % tile_f) != 0

    def kernel(w_ref, f_ref, u_ref, acc_w, acc_f):
        k = pl.program_id(1)

        @pl.when(k == 0)
        def _init():
            acc_w[...] = jnp.zeros_like(acc_w)
            acc_f[...] = jnp.zeros_like(acc_f)

        def w_plain():
            _accum_rows(jnp.abs(w_ref[...].astype(jnp.float32)), acc_w, tile_w, tile_h)

        def w_masked():   # only ever runs on the last (ragged) W row tile
            w = jnp.abs(w_ref[...].astype(jnp.float32))
            row = (n_w - 1) * tile_w + lax.broadcasted_iota(jnp.int32, (tile_w, 1), 0)
            _accum_rows(jnp.where(row < out_features, w, 0.0), acc_w, tile_w, tile_h)

        def f_plain():
            _accum_rows(jnp.abs(f_ref[...].astype(jnp.float32)), acc_f, tile_f, tile_h)

        def f_masked():   # only ever runs on the last (ragged) feature row tile
            f = jnp.abs(f_ref[...].astype(jnp.float32))
            row = (n_f - 1) * tile_f + lax.broadcasted_iota(jnp.int32, (tile_f, 1), 0)
            _accum_rows(jnp.where(row < batch, f, 0.0), acc_f, tile_f, tile_h)

        # Mask only on the last valid step; skip entirely past the end (static).
        if ragged_w:
            pl.when(k < n_w - 1)(w_plain)
            pl.when(k == n_w - 1)(w_masked)
        elif n_w == n_red:
            w_plain()
        else:
            pl.when(k < n_w)(w_plain)

        if ragged_f:
            pl.when(k < n_f - 1)(f_plain)
            pl.when(k == n_f - 1)(f_masked)
        elif n_f == n_red:
            f_plain()
        else:
            pl.when(k < n_f)(f_plain)

        @pl.when(k == n_red - 1)
        def _finalize():
            # single cross-sublane (XLU) reduce per hidden tile
            w_sum = jnp.sum(acc_w[...], axis=0, keepdims=True)
            f_sum = jnp.sum(acc_f[...], axis=0, keepdims=True)
            u_ref[...] = (w_sum * f_sum) * inv_scale

    # grid = (hidden tile j [parallel], reduction step k [arbitrary, last])
    w_idx = (lambda j, k: (k, j)) if n_w == n_red else \
            (lambda j, k: (jnp.minimum(k, n_w - 1), j))
    f_idx = (lambda j, k: (k, j)) if n_f == n_red else \
            (lambda j, k: (jnp.minimum(k, n_f - 1), j))

    util = pl.pallas_call(
        kernel,
        out_shape=jax.ShapeDtypeStruct((1, hidden_p), jnp.float32),
        grid_spec=pltpu.PrefetchScalarGridSpec(
            num_scalar_prefetch=0,
            grid=(n_h, n_red),
            in_specs=[
                pl.BlockSpec((tile_w, tile_h), w_idx),
                pl.BlockSpec((tile_f, tile_h), f_idx),
            ],
            out_specs=pl.BlockSpec((1, tile_h), lambda j, k: (0, j)),
            scratch_shapes=[
                pltpu.VMEM((8, tile_h), jnp.float32),
                pltpu.VMEM((8, tile_h), jnp.float32),
            ],
        ),
        compiler_params=pltpu.CompilerParams(
            dimension_semantics=("parallel", "arbitrary"),
            vmem_limit_bytes=vmem_limit,
        ),
    )(out_weight, features)
    return util[0, :hidden]


# TODO(synk): reinit()/reinit_features() are in-place training-time parameter
# surgery (data-dependent row scatter into weights / bias / norm stats) and
# get_features_to_reinit() is abstract; not part of forward and not kernelized.


if __name__ == "__main__":
    key = jax.random.PRNGKey(0)
    k_in, k_out, k_x, k_w2, k_f2 = jax.random.split(key, 5)

    # Small shapes consistent with the module: in_layer Linear(in_features, hidden),
    # out_layer Linear(hidden, out_features), features of shape (batch, hidden).
    in_features = 32
    hidden = 256
    out_features = 16
    batch = 8

    in_w, in_b = init_linear_params(k_in, in_features, hidden)
    out_w, out_b = init_linear_params(k_out, hidden, out_features)

    # bound / std computed exactly as __init__ does (kaiming + relu gain)
    gain = calculate_gain_relu()
    bound = get_layer_bound(in_features, hidden, init="kaiming", gain=gain)
    std = get_layer_std(in_features, hidden, init="kaiming", gain=gain)
    assert bound > 0.0 and std > 0.0

    # Forward pass: identity on the input tensor (no kernel, no copy).
    x = jax.random.normal(k_x, (batch, hidden), dtype=jnp.float32)
    y = jax.block_until_ready(reinit_linear_forward(x))
    assert jnp.allclose(y, x), "forward must be identity"

    # --- small-shape fast path (single full-array block), f32 -------------
    util = jax.block_until_ready(contribution_utility(out_w, y))
    util_ref = jnp.mean(jnp.abs(out_w), axis=0) * jnp.mean(jnp.abs(y), axis=0)
    assert util.shape == (hidden,)
    assert jnp.allclose(util, util_ref, rtol=1e-5, atol=1e-6)

    # --- small-shape fast path, bf16 inputs (cast inside the kernel) ------
    util_bf = jax.block_until_ready(
        contribution_utility(out_w.astype(jnp.bfloat16), y.astype(jnp.bfloat16)))
    util_bf_ref = (jnp.mean(jnp.abs(out_w.astype(jnp.bfloat16).astype(jnp.float32)), axis=0)
                   * jnp.mean(jnp.abs(y.astype(jnp.bfloat16).astype(jnp.float32)), axis=0))
    assert jnp.allclose(util_bf, util_bf_ref, rtol=1e-3, atol=1e-5)

    # --- tiled streaming path, forced at small shape (small caps) ---------
    # Exercises: hidden zero-padding (200 -> 256), ragged W row tile (20 % 8),
    # clamped feature index map (n_f < n_red), multi hidden-tile grid,
    # 8-sublane accumulators with a remainder (<8 rows) path.
    of2, b2, h2 = 20, 6, 200
    w2 = jax.random.normal(k_w2, (of2, h2), dtype=jnp.float32)
    f2 = jax.random.normal(k_f2, (b2, h2), dtype=jnp.float32)
    util2 = jax.block_until_ready(
        contribution_utility(w2, f2, row_cap=8, lane_cap=128, force_tiled=True))
    util2_ref = jnp.mean(jnp.abs(w2), axis=0) * jnp.mean(jnp.abs(f2), axis=0)
    assert util2.shape == (h2,)
    assert jnp.allclose(util2, util2_ref, rtol=1e-5, atol=1e-6)

    # --- tiled streaming path, bf16, multi-step reduction ------------------
    of3, b3, h3 = 32, 16, 256
    w3 = jax.random.normal(k_w2, (of3, h3), dtype=jnp.float32).astype(jnp.bfloat16)
    f3 = jax.random.normal(k_f2, (b3, h3), dtype=jnp.float32).astype(jnp.bfloat16)
    util3 = jax.block_until_ready(
        contribution_utility(w3, f3, row_cap=16, lane_cap=128, force_tiled=True))
    util3_ref = (jnp.mean(jnp.abs(w3.astype(jnp.float32)), axis=0)
                 * jnp.mean(jnp.abs(f3.astype(jnp.float32)), axis=0))
    assert jnp.allclose(util3, util3_ref, rtol=1e-3, atol=1e-5)

    print("KERNEL_OK")
</pallas_src>

<mosaic_0001>
module attributes {stable_mosaic.version = 11 : i64} {
  func.func @small_kernel(%arg0: i32, %arg1: memref<16x256xf32, #tpu.memory_space<vmem>>, %arg2: memref<8x256xf32, #tpu.memory_space<vmem>>, %arg3: memref<1x256xf32, #tpu.memory_space<vmem>>) attributes {dimension_semantics = [#tpu.dimension_semantics<arbitrary>], iteration_bounds = array<i64: 1>, scalar_prefetch = 0 : i64, scratch_operands = 0 : i64, tpu.core_type = #tpu.core_type<tc>, window_params = [{pipeline_mode = #tpu.pipeline_mode<synchronous>, transform_indices = @transform_0, window_bounds = array<i64: 16, 256>}, {pipeline_mode = #tpu.pipeline_mode<synchronous>, transform_indices = @transform_1, window_bounds = array<i64: 8, 256>}, {pipeline_mode = #tpu.pipeline_mode<synchronous>, transform_indices = @transform_2, window_bounds = array<i64: 1, 256>}]} {
    %c0 = arith.constant 0 : index
    %c0_0 = arith.constant 0 : index
    %0 = vector.load %arg1[%c0, %c0_0] : memref<16x256xf32, #tpu.memory_space<vmem>>, vector<16x256xf32>
    %1 = math.absf %0 : vector<16x256xf32>
    %cst = arith.constant dense<0.000000e+00> : vector<256xf32>
    %2 = vector.multi_reduction <add>, %1, %cst [0] : vector<16x256xf32> to vector<256xf32>
    %3 = vector.shape_cast %2 : vector<256xf32> to vector<1x256xf32>
    %c0_1 = arith.constant 0 : index
    %c0_2 = arith.constant 0 : index
    %4 = vector.load %arg2[%c0_1, %c0_2] : memref<8x256xf32, #tpu.memory_space<vmem>>, vector<8x256xf32>
    %5 = math.absf %4 : vector<8x256xf32>
    %cst_3 = arith.constant dense<0.000000e+00> : vector<256xf32>
    %6 = vector.multi_reduction <add>, %5, %cst_3 [0] : vector<8x256xf32> to vector<256xf32>
    %7 = vector.shape_cast %6 : vector<256xf32> to vector<1x256xf32>
    %8 = arith.mulf %3, %7 : vector<1x256xf32>
    %cst_4 = arith.constant 7.812500e-03 : f32
    %9 = vector.broadcast %cst_4 : f32 to vector<1x256xf32>
    %10 = arith.mulf %8, %9 : vector<1x256xf32>
    %c0_5 = arith.constant 0 : index
    %c0_6 = arith.constant 0 : index
    %11 = vector.load %arg3[%c0_5, %c0_6] : memref<1x256xf32, #tpu.memory_space<vmem>>, vector<1x256xf32>
    tpu.vector_store %arg3[%c0_5, %c0_6], %10 {strides = array<i32>} : memref<1x256xf32, #tpu.memory_space<vmem>>, vector<1x256xf32>,
    return
  }
  func.func @transform_0(%arg0: i32) -> (i32, i32) {
    %c0_i32 = arith.constant 0 : i32
    %c0_i32_0 = arith.constant 0 : i32
    %c0_i32_1 = arith.constant 0 : i32
    return %c0_i32, %c0_i32_0 : i32, i32
  }
  func.func @transform_1(%arg0: i32) -> (i32, i32) {
    %c0_i32 = arith.constant 0 : i32
    %c0_i32_0 = arith.constant 0 : i32
    %c0_i32_1 = arith.constant 0 : i32
    return %c0_i32, %c0_i32_0 : i32, i32
  }
  func.func @transform_2(%arg0: i32) -> (i32, i32) {
    %c0_i32 = arith.constant 0 : i32
    %c0_i32_0 = arith.constant 0 : i32
    %c0_i32_1 = arith.constant 0 : i32
    return %c0_i32, %c0_i32_0 : i32, i32
  }
}

</mosaic_0001>

<bundles_post_ra>
// kernel: tpu_custom_call.1
= control target key start
LH: loop header
LB: loop body
LE: loop exit
PB: predicated region body
PF: predicated region fallthrough
CT: control target
= control target key end

     0   :  { %7 = vsyncpa [#allocation3], 0  ;;  %s254_s0 = inlined_call_operand.hbm [shape: f32[16,256], index: 0, kind: input, shape index: {}]   ;;  %s255_s1 = inlined_call_operand.hbm [shape: f32[8,256], index: 1, kind: input, shape index: {}]   ;;  %s256_s2 = inlined_call_operand.hbm [shape: f32[1,256], index: 2, kind: output, shape index: {}]  }
   0x1   :  { %8 = vsyncpa [#allocation6], 0 }
   0x2   :  { %9 = vsyncpa [#allocation4], 0  ;;  %s197_s9 = smov [#allocation2]   ;;  %s125_s13 = scalar_lea.hbm %s254_s0, 512 }
   0x3   :  { %s15_s10 = sshll.u32 %s197_s9, 4  ;;  %p126_p0 = scmp.ne.s32.totalorder %s254_s0, %s125_s13  ;;  %s16_s10 = int_to_ptr.vmem [resolvable:$true] %s15_s10 }
   0x4   :  { %p129_p1 = scmp.lt.u32.totalorder %s125_s13, %s254_s0 }
   0x6   :  { %p131_p2 = pnand %p129_p1, %p126_p0 }
   0x8   :  { %134 = shalt.err (!%p131_p2)
}
   0x9   :  { %s135_s18 = scalar_lea.vmem %s16_s10, 512  ;;  %p140_p4 = scmp.lt.s32.totalorder %s16_s10, %s16_s10 }
   0xa   :  { %p136_p3 = scmp.ne.s32.totalorder %s16_s10, %s135_s18  ;;  %p141_p5 = scmp.lt.s32.totalorder %s135_s18, %s135_s18 }
   0xc   :  { %p142_p6 = por %p141_p5, %p140_p4 }
   0xe   :  { %p143_p7 = pnand %p142_p6, %p136_p3 }
  0x10   :  { %146 = shalt.err (!%p143_p7)
}
  0x11   :  { %s198_s19 = smov 256   ;;  %s199_s20 = smov 16  }
  0x12   :  { %21 = dma.hbm_to_vmem [thread:$0]  %s254_s0, 512, %s16_s10, [#allocation3], %s198_s19, %s198_s19, %s199_s20  }
  0x13   :  { %s200_s23 = smov [#allocation5]   ;;  %s147_s27 = scalar_lea.hbm %s255_s1, 256 }
  0x14   :  { %s28_s24 = sshll.u32 %s200_s23, 4  ;;  %p148_p8 = scmp.ne.s32.totalorder %s255_s1, %s147_s27  ;;  %s29_s24 = int_to_ptr.vmem [resolvable:$true] %s28_s24 }
  0x15   :  { %p151_p9 = scmp.lt.u32.totalorder %s147_s27, %s255_s1 }
  0x17   :  { %p153_p10 = pnand %p151_p9, %p148_p8 }
  0x19   :  { %156 = shalt.err (!%p153_p10)
}
  0x1a   :  { %s157_s4 = scalar_lea.vmem %s29_s24, 256  ;;  %p162_p12 = scmp.lt.s32.totalorder %s29_s24, %s29_s24 }
  0x1b   :  { %p158_p11 = scmp.ne.s32.totalorder %s29_s24, %s157_s4  ;;  %p163_p13 = scmp.lt.s32.totalorder %s157_s4, %s157_s4 }
  0x1d   :  { %p164_p0 = por %p163_p13, %p162_p12 }
  0x1f   :  { %p165_p1 = pnand %p164_p0, %p158_p11 }
  0x21   :  { %168 = shalt.err (!%p165_p1)
}
  0x22   :  { %31 = dma.hbm_to_vmem [thread:$0]  %s255_s1, 256, %s29_s24, [#allocation6]  }
  0x23   :  { %191 = dma.done.wait [#allocation3], 512  }
  0x24   :  { %192 = vsyncadd [#allocation3], 4294966784 }
  0x25   :  { %193 = dma.done.wait [#allocation6], 256  }
  0x26   :  { %194 = vsyncadd [#allocation6], 4294967040  ;;  %v38_v0 = vld [vmem:[#allocation2] sm:$0xff]  ;;  %v39_v1 = vld [vmem:[#allocation2 + $0x8] sm:$0xff]  ;;  %v201_v30 = vmov 1966171168   ;;  %v86_v32 = vlaneseq }
  0x27   :  { %v40_v2 = vld [vmem:[#allocation2 + $0x10] sm:$0xff]  ;;  %v41_v3 = vld [vmem:[#allocation2 + $0x18] sm:$0xff]  ;;  %v42_v4 = vand.u32 2147483647, %v38_v0  ;;  %v43_v5 = vand.u32 2147483647, %v39_v1  ;;  %v84_v31 = vunpack.c.l.s4 %v201_v30 }
  0x28   :  { %v60_v6 = vld [vmem:[#allocation5] sm:$0xff]  ;;  %v44_v7 = vand.u32 2147483647, %v40_v2  ;;  %v45_v8 = vand.u32 2147483647, %v41_v3  ;;  %v61_v9 = vld [vmem:[#allocation5 + $0x8] sm:$0xff] }
  0x29   :  { %v62_v10 = vand.u32 2147483647, %v60_v6  ;;  %v63_v11 = vand.u32 2147483647, %v61_v9  ;;  %v85_v41 = vunpack.c.0.s8 %v84_v31  ;;  %v87_v42 = vshrl.u32 %v86_v32, 7  ;;  %s202_s1 = smov [#allocation7]  }
  0x2a   :  { %v46_v12 = vadd.f32 %v44_v7, %v42_v4  ;;  %v53_v13 = vadd.f32 %v45_v8, %v43_v5  ;;  %s109_s6 = sshll.u32 %s202_s1, 4  ;;  %vm100_vm0 = vcmp.lt.s32.totalorder %v86_v32, 256  ;;  %s110_s6 = int_to_ptr.vmem [resolvable:$true] %s109_s6 }
  0x2b   :  { %v64_v14 = vrot.slane %v62_v10, 4  ;;  %v70_v15 = vrot.slane %v63_v11, 4  ;;  %v88_v47 = vsub.s32 %v85_v41, %v87_v42  ;;  %s169_s7 = scalar_lea.vmem %s110_s6, 32  ;;  %p174_p3 = scmp.lt.s32.totalorder %s110_s6, %s110_s6 }
  0x2c   :  { %v47_v16 = vrot.slane %v46_v12, 4  ;;  %v54_v17 = vrot.slane %v53_v13, 4  ;;  %p170_p2 = scmp.ne.s32.totalorder %s110_s6, %s169_s7  ;;  %p175_p4 = scmp.lt.s32.totalorder %s169_s7, %s169_s7 }
  0x2d   :  { %v65_v18 = vadd.f32 %v64_v14, %v62_v10  ;;  %v71_v19 = vadd.f32 %v70_v15, %v63_v11 }
  0x2e   :  { %v48_v20 = vadd.f32 %v47_v16, %v46_v12  ;;  %v55_v21 = vadd.f32 %v54_v17, %v53_v13  ;;  %p176_p5 = por %p175_p4, %p174_p3 }
  0x2f   :  { %v66_v22 = vrot.slane %v65_v18, 2  ;;  %v72_v23 = vrot.slane %v71_v19, 2 }
  0x30   :  { %v49_v24 = vrot.slane %v48_v20, 2  ;;  %v56_v25 = vrot.slane %v55_v21, 2  ;;  %p177_p6 = pnand %p176_p5, %p170_p2 }
  0x31   :  { %v67_v26 = vadd.f32 %v66_v22, %v65_v18  ;;  %v73_v27 = vadd.f32 %v72_v23, %v71_v19 }
  0x32   :  { %v50_v28 = vadd.f32 %v49_v24, %v48_v20  ;;  %v57_v29 = vadd.f32 %v56_v25, %v55_v21 }
  0x33   :  { %v68_v33 = vrot.slane %v67_v26, 1  ;;  %v74_v34 = vrot.slane %v73_v27, 1 }
  0x34   :  { %v51_v35 = vrot.slane %v50_v28, 1  ;;  %v58_v36 = vrot.slane %v57_v29, 1 }
  0x35   :  { %v69_v37 = vadd.f32 %v68_v33, %v67_v26  ;;  %v75_v38 = vadd.f32 %v74_v34, %v73_v27 }
  0x36   :  { %v52_v39 = vadd.f32 %v51_v35, %v50_v28  ;;  %v59_v40 = vadd.f32 %v58_v36, %v57_v29 }
  0x38   :  { %v76_v43 = vmul.f32 %v69_v37, %v52_v39  ;;  %v77_v44 = vmul.f32 %v75_v38, %v59_v40 }
  0x3a   :  { %v78_v45 = vmul.f32 0.0078125, %v76_v43  ;;  %v79_v46 = vmul.f32 0.0078125, %v77_v44 }
  0x3c   :  { %v82_v48 = vcombine.low %v78_v45, %v79_v46 }
  0x3e   :  { %v89_v49 = vrot.slane %v82_v48, %v88_v47 }
  0x40   :  { %v96_v50 = vrot.slane %v89_v49, %v88_v47 }
  0x42   :  { %102 = vst.msk [vmem:[#allocation7] sm:$0x3] %vm100_vm0, %v96_v50 }
  0x43   :  { %180 = shalt.err (!%p177_p6)
}
  0x44   :  { %s181_s10 = scalar_lea.hbm %s256_s2, 32 }
  0x45   :  { %p182_p7 = scmp.ne.s32.totalorder %s256_s2, %s181_s10  ;;  %p185_p8 = scmp.lt.u32.totalorder %s181_s10, %s256_s2 }
  0x47   :  { %p187_p9 = pnand %p185_p8, %p182_p7 }
  0x49   :  { %190 = shalt.err (!%p187_p9)
}
  0x4a   :  { %112 = dma.vmem_to_hbm [thread:$0]  %s110_s6, 32, %s256_s2, [#allocation4]  }
  0x4b   :  { %195 = dma.done.wait [#allocation4], 32  }
  0x4c   :  { %196 = vsyncadd [#allocation4], 4294967264 }
  0x4d   :  { %116 = vsyncpa [#allocation3], 1 }
  0x4e   :  { %117 = vsyncpa [#allocation6], 1 }
  0x4f   :  { %118 = vsyncpa [#allocation4], 1 }

</bundles_post_ra>
